<compile_context>
chip_gen: v5e
topology: v5e:2x2
jax: 0.10.0
libtpu: 0.0.40
codegen_flags: <defaults>
</compile_context>

<pallas_src>
import functools

import jax
import jax.numpy as jnp
from jax import lax
from jax.experimental import pallas as pl
from jax.experimental.pallas import tpu as pltpu

LANES = 128
SUBLANES = 8
MAX_TILE_ROWS = 8192   # 8192 x 128 f32 = 4 MiB per input block
CHUNK_ROWS = 512       # in-kernel row-chunk; caps live f32 temps to ~256 KiB


def _cdiv(a, b):
    return -(-a // b)


def _round_up(x, m):
    return _cdiv(x, m) * m


def _make_bce_kernel(n, tile_rows, num_blocks, needs_mask, valid_rows_last):
    """Builds the kernel body with all tiling parameters baked in statically."""
    num_chunks = _cdiv(tile_rows, CHUNK_ROWS)

    def kernel(x_ref, y_ref, out_ref):
        # Each grid step owns its own (8,128) output tile -> zero, then
        # accumulate per row-chunk (keeps intermediates small).
        out_ref[...] = jnp.zeros_like(out_ref)
        pid = pl.program_id(0)

        def accumulate(c0, nrows, masked):
            x = x_ref[pl.ds(c0, nrows), :].astype(jnp.float32)
            y = y_ref[pl.ds(c0, nrows), :].astype(jnp.float32)
            if masked:
                # Global element index of every lane in this chunk; elements
                # >= n are either lane padding or rows past the array end
                # (undefined VMEM contents) -> sanitize before the math and
                # zero their loss contribution. (int32 index: n < 2**31.)
                ridx = lax.broadcasted_iota(jnp.int32, (nrows, LANES), 0)
                lidx = lax.broadcasted_iota(jnp.int32, (nrows, LANES), 1)
                gidx = (ridx + (pid * tile_rows + c0)) * LANES + lidx
                m = gidx < n
                x = jnp.where(m, x, 0.0)
                y = jnp.where(m, y, 0.0)
            # Numerically-stable BCE-with-logits (nn.BCEWithLogitsLoss):
            #   loss = max(x, 0) - x*y + log1p(exp(-|x|))
            loss = jnp.maximum(x, 0.0) - x * y + jnp.log1p(jnp.exp(-jnp.abs(x)))
            if masked:
                loss = jnp.where(m, loss, 0.0)
            # (8,128)-tile-preserving reshape; axis-0 sum is plain vreg adds.
            out_ref[...] += jnp.sum(
                loss.reshape(nrows // SUBLANES, SUBLANES, LANES), axis=0)

        for c in range(num_chunks):
            c0 = c * CHUNK_ROWS
            nrows = min(CHUNK_ROWS, tile_rows - c0)
            if not needs_mask:
                # Clean case: every element of every block is valid.
                accumulate(c0, nrows, masked=False)
            else:
                # All blocks except the last are fully valid -> unmasked.
                @pl.when(pid != num_blocks - 1)
                def _(c0=c0, nrows=nrows):
                    accumulate(c0, nrows, masked=False)

                # Last block: only chunks holding valid rows do (masked) work.
                if c0 < valid_rows_last:
                    @pl.when(pid == num_blocks - 1)
                    def _(c0=c0, nrows=nrows):
                        accumulate(c0, nrows, masked=True)

    return kernel


def bce_loss_2d_ref(logits, labels):
    """Pure-JAX reference mirroring nn.BCEWithLogitsLoss (mean reduction)."""
    x = logits.astype(jnp.float32).reshape(-1)
    y = labels.astype(jnp.float32).reshape(-1)
    loss = jnp.maximum(x, 0.0) - x * y + jnp.log1p(jnp.exp(-jnp.abs(x)))
    return jnp.mean(loss)


def bce_loss_2d_pallas(logits, labels, *, small_input_threshold=64 * 1024):
    if logits.shape != labels.shape:
        raise ValueError(
            "Target size ({}) must be the same as input size ({})".format(
                labels.shape, logits.shape))

    n = int(logits.size)

    # Small-input fast path: fixed kernel-launch / pipeline overhead dominates
    # tiny inputs; the plain-JAX expression is faster there.
    if n < small_input_threshold:
        return bce_loss_2d_ref(logits, labels)

    x = logits.reshape(-1)
    y = labels.reshape(-1)

    rows = _cdiv(n, LANES)
    lane_pad = rows * LANES - n
    if lane_pad:
        # Rare fallback (n % 128 != 0): pad with zeros in the input dtype; the
        # in-kernel element mask (gidx < n) makes the result exact, so the pad
        # value itself does not matter.
        x = jnp.pad(x, (0, lane_pad))
        y = jnp.pad(y, (0, lane_pad))
    x2 = x.reshape(rows, LANES)
    y2 = y.reshape(rows, LANES)

    # Tile selection: balanced across blocks, <= MAX_TILE_ROWS, and >= 2 grid
    # steps whenever possible so v7x's two TensorCores both get work.
    if rows <= 2 * SUBLANES:
        nblk_target = 1
    else:
        nblk_target = max(2, _cdiv(rows, MAX_TILE_ROWS))
    tile_rows = min(MAX_TILE_ROWS, _round_up(_cdiv(rows, nblk_target), SUBLANES))
    num_blocks = _cdiv(rows, tile_rows)
    valid_rows_last = rows - (num_blocks - 1) * tile_rows
    # Masking is needed iff the padded grid covers more elements than n
    # (ragged last block and/or lane padding).
    needs_mask = (num_blocks * tile_rows * LANES) != n

    kernel = _make_bce_kernel(
        n=n, tile_rows=tile_rows, num_blocks=num_blocks,
        needs_mask=needs_mask, valid_rows_last=valid_rows_last)

    out_rows = num_blocks * SUBLANES
    bytes_accessed = (x2.size * x2.dtype.itemsize
                      + y2.size * y2.dtype.itemsize
                      + out_rows * LANES * 4)

    partials = pl.pallas_call(
        kernel,
        out_shape=jax.ShapeDtypeStruct((out_rows, LANES), jnp.float32),
        grid=(num_blocks,),
        in_specs=[
            pl.BlockSpec((tile_rows, LANES), lambda i: (i, 0)),
            pl.BlockSpec((tile_rows, LANES), lambda i: (i, 0)),
        ],
        out_specs=pl.BlockSpec((SUBLANES, LANES), lambda i: (i, 0)),
        compiler_params=pltpu.CompilerParams(
            dimension_semantics=("parallel",),
            vmem_limit_bytes=32 * 1024 * 1024),
        cost_estimate=pl.CostEstimate(
            flops=6 * n, transcendentals=2 * n,
            bytes_accessed=bytes_accessed),
    )(x2, y2)

    # Tiny final reduction + mean over the ORIGINAL element count.  Dividing
    # by the Python int keeps weak typing (no float32(n) precision loss).
    return jnp.sum(partials) / n


if __name__ == "__main__":
    key = jax.random.PRNGKey(0)
    k1, k2, k3, k4 = jax.random.split(key, 4)

    # 1) Small NCHW test, force the Pallas path (single clean block).
    B, C, H, W = 2, 4, 16, 16
    logits = jax.random.normal(k1, (B, C, H, W), dtype=jnp.float32) * 2.0
    labels = (jax.random.uniform(k2, (B, C, H, W)) > 0.7).astype(jnp.float32)
    out = bce_loss_2d_pallas(logits, labels, small_input_threshold=0)
    out = jax.block_until_ready(out)
    ref = bce_loss_2d_ref(logits, labels)
    assert jnp.allclose(out, ref, rtol=1e-5, atol=1e-5), (out, ref)

    # 2) Default wrapper (small-input fast path) must also match.
    out_fast = jax.block_until_ready(bce_loss_2d_pallas(logits, labels))
    assert jnp.allclose(out_fast, ref, rtol=1e-5, atol=1e-5), (out_fast, ref)

    # 3) Multi-block grid + in-kernel tail mask (rows not a tile multiple),
    #    bf16 logits passed through without a wrapper-side cast.
    logits3 = jax.random.normal(k3, (2, 4, 40, 48), dtype=jnp.bfloat16)
    labels3 = (jax.random.uniform(k4, (2, 4, 40, 48)) > 0.5).astype(jnp.float32)
    out3 = jax.block_until_ready(
        bce_loss_2d_pallas(logits3, labels3, small_input_threshold=0))
    ref3 = bce_loss_2d_ref(logits3, labels3)
    assert jnp.allclose(out3, ref3, rtol=1e-4, atol=1e-5), (out3, ref3)

    # 4) n % 128 != 0 -> tiny zero-pad fallback + in-kernel element mask.
    logits4 = jax.random.normal(k1, (2, 4, 17, 15), dtype=jnp.float32)
    labels4 = (jax.random.uniform(k2, (2, 4, 17, 15)) > 0.3).astype(jnp.float32)
    out4 = jax.block_until_ready(
        bce_loss_2d_pallas(logits4, labels4, small_input_threshold=0))
    ref4 = bce_loss_2d_ref(logits4, labels4)
    assert jnp.allclose(out4, ref4, rtol=1e-4, atol=1e-5), (out4, ref4)

    print("KERNEL_OK")
</pallas_src>

<mosaic_0001>
module attributes {stable_mosaic.version = 11 : i64} {
  func.func @kernel(%arg0: i32, %arg1: memref<16x128xf32, #tpu.memory_space<vmem>>, %arg2: memref<16x128xf32, #tpu.memory_space<vmem>>, %arg3: memref<8x128xf32, #tpu.memory_space<vmem>>) attributes {dimension_semantics = [#tpu.dimension_semantics<parallel>], iteration_bounds = array<i64: 1>, scalar_prefetch = 0 : i64, scratch_operands = 0 : i64, tpu.core_type = #tpu.core_type<tc>, window_params = [{transform_indices = @transform_0, window_bounds = array<i64: 16, 128>}, {transform_indices = @transform_1, window_bounds = array<i64: 16, 128>}, {transform_indices = @transform_2, window_bounds = array<i64: 8, 128>}]} {
    %cst = arith.constant 0.000000e+00 : f32
    %0 = vector.broadcast %cst : f32 to vector<8x128xf32>
    %c0 = arith.constant 0 : index
    %c0_0 = arith.constant 0 : index
    %1 = vector.load %arg3[%c0, %c0_0] : memref<8x128xf32, #tpu.memory_space<vmem>>, vector<8x128xf32>
    tpu.vector_store %arg3[%c0, %c0_0], %0 {strides = array<i32>} : memref<8x128xf32, #tpu.memory_space<vmem>>, vector<8x128xf32>,
    %c0_1 = arith.constant 0 : index
    %c0_2 = arith.constant 0 : index
    %2 = vector.load %arg1[%c0_1, %c0_2] : memref<16x128xf32, #tpu.memory_space<vmem>>, vector<16x128xf32>
    %c0_3 = arith.constant 0 : index
    %c0_4 = arith.constant 0 : index
    %3 = vector.load %arg2[%c0_3, %c0_4] : memref<16x128xf32, #tpu.memory_space<vmem>>, vector<16x128xf32>
    %cst_5 = arith.constant 0.000000e+00 : f32
    %4 = vector.broadcast %cst_5 : f32 to vector<16x128xf32>
    %5 = arith.maximumf %2, %4 : vector<16x128xf32>
    %6 = arith.mulf %2, %3 : vector<16x128xf32>
    %7 = arith.subf %5, %6 : vector<16x128xf32>
    %8 = math.absf %2 : vector<16x128xf32>
    %cst_6 = arith.constant 0.000000e+00 : f32
    %9 = vector.broadcast %cst_6 : f32 to vector<16x128xf32>
    %10 = arith.subf %9, %8 : vector<16x128xf32>
    %11 = math.exp %10 : vector<16x128xf32>
    %12 = math.log1p %11 : vector<16x128xf32>
    %13 = arith.addf %7, %12 : vector<16x128xf32>
    %c0_7 = arith.constant 0 : index
    %c0_8 = arith.constant 0 : index
    %14 = vector.load %arg3[%c0_7, %c0_8] : memref<8x128xf32, #tpu.memory_space<vmem>>, vector<8x128xf32>
    %15 = vector.shape_cast %13 : vector<16x128xf32> to vector<2x8x128xf32>
    %cst_9 = arith.constant dense<0.000000e+00> : vector<8x128xf32>
    %16 = vector.multi_reduction <add>, %15, %cst_9 [0] : vector<2x8x128xf32> to vector<8x128xf32>
    %17 = arith.addf %14, %16 : vector<8x128xf32>
    %c0_10 = arith.constant 0 : index
    %c0_11 = arith.constant 0 : index
    %18 = vector.load %arg3[%c0_10, %c0_11] : memref<8x128xf32, #tpu.memory_space<vmem>>, vector<8x128xf32>
    tpu.vector_store %arg3[%c0_10, %c0_11], %17 {strides = array<i32>} : memref<8x128xf32, #tpu.memory_space<vmem>>, vector<8x128xf32>,
    return
  }
  func.func @transform_0(%arg0: i32) -> (i32, i32) {
    %c0_i32 = arith.constant 0 : i32
    %c0_i32_0 = arith.constant 0 : i32
    return %arg0, %c0_i32 : i32, i32
  }
  func.func @transform_1(%arg0: i32) -> (i32, i32) {
    %c0_i32 = arith.constant 0 : i32
    %c0_i32_0 = arith.constant 0 : i32
    return %arg0, %c0_i32 : i32, i32
  }
  func.func @transform_2(%arg0: i32) -> (i32, i32) {
    %c0_i32 = arith.constant 0 : i32
    %c0_i32_0 = arith.constant 0 : i32
    return %arg0, %c0_i32 : i32, i32
  }
}

</mosaic_0001>

<bundles_post_ra>
// kernel: tpu_custom_call.1
= control target key start
LH: loop header
LB: loop body
LE: loop exit
PB: predicated region body
PF: predicated region fallthrough
CT: control target
= control target key end

     0   :  { %7 = vsyncpa [#allocation3], 0  ;;  %s226_s0 = inlined_call_operand.hbm [shape: f32[16,128], index: 0, kind: input, shape index: {}]   ;;  %s227_s1 = inlined_call_operand.hbm [shape: f32[16,128], index: 1, kind: input, shape index: {}]   ;;  %s228_s2 = inlined_call_operand.hbm [shape: f32[8,128], index: 2, kind: output, shape index: {}]  }
   0x1   :  { %8 = vsyncpa [#allocation6], 0 }
   0x2   :  { %9 = vsyncpa [#allocation4], 0  ;;  %s14_s11 = sshll.u32 %s226_s0, 4  ;;  %s197_s12 = smov [#allocation2]   ;;  %s15_s11 = int_to_ptr.hbm [resolvable:$true] %s14_s11 }
   0x3   :  { %s16_s13 = sshll.u32 %s197_s12, 4  ;;  %s27_s16 = sshll.u32 %s227_s1, 4  ;;  %s17_s13 = int_to_ptr.vmem [resolvable:$true] %s16_s13  ;;  %s28_s16 = int_to_ptr.hbm [resolvable:$true] %s27_s16 }
   0x4   :  { %s198_s17 = smov 128   ;;  %s199_s18 = smov 8  }
   0x5   :  { %22 = dma.hbm_to_vmem [thread:$0]  %s15_s11, 256, %s17_s13, [#allocation3], %s198_s17, %s198_s17, %s199_s18  }
   0x6   :  { %s200_s19 = smov [#allocation5]  }
   0x7   :  { %s29_s20 = sshll.u32 %s200_s19, 4  ;;  %s30_s20 = int_to_ptr.vmem [resolvable:$true] %s29_s20 }
   0x8   :  { %35 = dma.hbm_to_vmem [thread:$0]  %s28_s16, 256, %s30_s20, [#allocation6], %s198_s17, %s198_s17, %s199_s18  }
   0x9   :  { %191 = dma.done.wait [#allocation3], 256  }
   0xa   :  { %192 = vsyncadd [#allocation3], 4294967040 }
   0xb   :  { %193 = dma.done.wait [#allocation6], 256  }
   0xc   :  { %194 = vsyncadd [#allocation6], 4294967040  ;;  %v45_v0 = vld [vmem:[#allocation2] sm:$0xff]  ;;  %v46_v1 = vld [vmem:[#allocation2 + $0x8] sm:$0xff]  ;;  %s201_s0 = smov [#allocation7]   ;;  %s94_s23 = sshll.u32 %s228_s2, 4  ;;  %s95_s23 = int_to_ptr.hbm [resolvable:$true] %s94_s23 }
   0xd   :  { %v55_v2 = vand.u32 2147483647, %v45_v0  ;;  %v56_v3 = vand.u32 2147483647, %v46_v1  ;;  %v47_v12 = vld [vmem:[#allocation5] sm:$0xff]  ;;  %v48_v15 = vld [vmem:[#allocation5 + $0x8] sm:$0xff] }
   0xe   :  { %v49_v17 = vmax.f32 %v45_v0, 0.0  ;;  %v51_v18 = vmul.f32 %v47_v12, %v45_v0  ;;  %v50_v21 = vmax.f32 %v46_v1, 0.0  ;;  %v52_v22 = vmul.f32 %v48_v15, %v46_v1  ;;  %s92_s1 = sshll.u32 %s201_s0, 4  ;;  %s93_s1 = int_to_ptr.vmem [resolvable:$true] %s92_s1 }
   0xf   :  { %v57_v4 = vsub.f32 0.0, %v55_v2  ;;  %v58_v5 = vsub.f32 0.0, %v56_v3 }
  0x10   :  { %v53_v26 = vsub.f32 %v49_v17, %v51_v18  ;;  %v54_v29 = vsub.f32 %v50_v21, %v52_v22 }
  0x11   :  { %v59_v6 = vmul.f32 1.442695, %v57_v4  ;;  %v61_v7 = vmul.f32 1.442695, %v58_v5 }
  0x13   :  { %111 = vpow2.f32 %v59_v6 }
  0x14   :  { %113 = vpow2.f32 %v61_v7 }
  0x19   :  { %v112_v8 = vpop.eup %111 }
  0x1a   :  { %v114_v9 = vpop.eup %113  ;;  %v63_v10 = vadd.f32 1.0, %v112_v8  ;;  %v66_v11 = vmul.f32 -0.5, %v112_v8  ;;  %v69_v19 = vand.u32 2147483647, %v112_v8 }
  0x1b   :  { %v72_v13 = vadd.f32 1.0, %v114_v9  ;;  %v75_v14 = vmul.f32 -0.5, %v114_v9  ;;  %v78_v23 = vand.u32 2147483647, %v114_v9 }
  0x1c   :  { %115 = vlog2.f32 %v63_v10  ;;  %v67_v16 = vadd.f32 1.0, %v66_v11  ;;  %vm70_vm0 = vcmp.lt.f32.partialorder %v69_v19, 0.0004427343 }
  0x1d   :  { %117 = vlog2.f32 %v72_v13  ;;  %v76_v20 = vadd.f32 1.0, %v75_v14  ;;  %vm79_vm1 = vcmp.lt.f32.partialorder %v78_v23, 0.0004427343 }
  0x1e   :  { %v68_v24 = vmul.f32 %v112_v8, %v67_v16 }
  0x1f   :  { %v77_v27 = vmul.f32 %v114_v9, %v76_v20 }
  0x22   :  { %v116_v25 = vpop.eup %115 }
  0x23   :  { %v118_v28 = vpop.eup %117  ;;  %v65_v30 = vmul.f32 0.6931472, %v116_v25 }
  0x24   :  { %v74_v31 = vmul.f32 0.6931472, %v118_v28 }
  0x25   :  { %v71_v32 = vsel %vm70_vm0, %v68_v24, %v65_v30 }
  0x26   :  { %v80_v33 = vsel %vm79_vm1, %v77_v27, %v74_v31  ;;  %v81_v34 = vadd.f32 %v71_v32, %v53_v26 }
  0x27   :  { %v82_v35 = vadd.f32 %v80_v33, %v54_v29 }
  0x29   :  { %v84_v36 = vadd.f32 %v82_v35, %v81_v34 }
  0x2b   :  { %86 = vst [vmem:[#allocation7] sm:$0xff] %v84_v36 }
  0x2c   :  { %97 = dma.vmem_to_hbm [thread:$0]  %s93_s1, 128, %s95_s23, [#allocation4]  }
  0x2d   :  { %195 = dma.done.wait [#allocation4], 128  }
  0x2e   :  { %196 = vsyncadd [#allocation4], 4294967168 }
  0x2f   :  { %102 = vsyncpa [#allocation3], 1 }
  0x30   :  { %103 = vsyncpa [#allocation6], 1 }
  0x31   :  { %104 = vsyncpa [#allocation4], 1 }

</bundles_post_ra>
